<compile_context>
chip_gen: v5e
topology: v5e:2x2
jax: 0.10.0
libtpu: 0.0.40
codegen_flags: <defaults>
</compile_context>

<pallas_src>
import jax
import jax.numpy as jnp
from jax import lax
from jax.experimental import pallas as pl
from jax.experimental.pallas import tpu as pltpu


def _round_up(x: int, m: int) -> int:
    return ((x + m - 1) // m) * m


def _zone_kernel(x_ref, w_ref, o_ref, acc_ref):
    # x_ref: (tm, tk)   activation tile
    # w_ref: (tn, tk)   weight tile in PyTorch (out, in) layout -> contract
    #                   the last dim of both operands on the MXU (no transpose
    #                   ever materialized in HBM).
    # o_ref: (tm, tn)   output tile (resident across the K grid axis)
    # acc_ref: (tm, tn) f32 accumulator scratch
    @pl.when(pl.program_id(2) == 0)
    def _init():
        acc_ref[...] = jnp.zeros_like(acc_ref)

    acc_ref[...] += lax.dot_general(
        x_ref[...],
        w_ref[...],
        dimension_numbers=(((1,), (1,)), ((), ())),
        preferred_element_type=jnp.float32,
    )

    @pl.when(pl.program_id(2) == pl.num_programs(2) - 1)
    def _store():
        o_ref[...] = acc_ref[...].astype(o_ref.dtype)


def zone_forward(x, weight, *, tm: int = 256, tn: int = 256, tk: int = 256):
    """Bias-free linear layer: y = x @ weight.T

    x:      (batch, input_size)
    weight: (output_size, input_size)   -- PyTorch nn.Linear convention
    returns (batch, output_size)
    """
    M, K = x.shape
    N, Kw = weight.shape
    assert K == Kw, "input_size mismatch between x and weight"

    # Clamp tile sizes for small problems while keeping (8, 128) alignment:
    #   tm -> sublane dim of x/out blocks   (multiple of 8)
    #   tn -> lane dim of out block         (multiple of 128, lane-dense)
    #   tk -> lane dim of x/weight blocks   (multiple of 128)
    tm = min(tm, _round_up(M, 8))
    tn = min(tn, _round_up(N, 128))
    tk = min(tk, _round_up(K, 128))

    M_pad = _round_up(M, tm)
    N_pad = _round_up(N, tn)
    K_pad = _round_up(K, tk)

    # Zero-pad to tile-aligned shapes (plain-JAX glue; identity when already
    # aligned).  Zero padding along K leaves the matmul result unchanged.
    if (M_pad, K_pad) != (M, K):
        x = jnp.pad(x, ((0, M_pad - M), (0, K_pad - K)))
    if (N_pad, K_pad) != (N, Kw):
        weight = jnp.pad(weight, ((0, N_pad - N), (0, K_pad - Kw)))

    grid = (M_pad // tm, N_pad // tn, K_pad // tk)

    itemsize = jnp.dtype(x.dtype).itemsize
    # Double-buffered x / w / out tiles + f32 accumulator, plus 2x headroom,
    # capped at 32 MiB (within the scoped default of every TPU generation).
    vmem_needed = 2 * (tm * tk + tn * tk + tm * tn) * itemsize + tm * tn * 4
    vmem_limit = int(min(max(2 * vmem_needed, 16 * 1024 * 1024),
                         32 * 1024 * 1024))

    cost = pl.CostEstimate(
        flops=2 * M_pad * N_pad * K_pad,
        transcendentals=0,
        bytes_accessed=(M_pad * K_pad + N_pad * K_pad + M_pad * N_pad)
        * itemsize,
    )

    out = pl.pallas_call(
        _zone_kernel,
        out_shape=jax.ShapeDtypeStruct((M_pad, N_pad), x.dtype),
        grid_spec=pltpu.PrefetchScalarGridSpec(
            num_scalar_prefetch=0,
            grid=grid,
            in_specs=[
                pl.BlockSpec((tm, tk), lambda i, j, k: (i, k)),
                pl.BlockSpec((tn, tk), lambda i, j, k: (j, k)),
            ],
            out_specs=pl.BlockSpec((tm, tn), lambda i, j, k: (i, j)),
            scratch_shapes=[pltpu.VMEM((tm, tn), jnp.float32)],
        ),
        compiler_params=pltpu.CompilerParams(
            dimension_semantics=("parallel", "parallel", "arbitrary"),
            vmem_limit_bytes=vmem_limit,
        ),
        cost_estimate=cost,
    )(x, weight)

    if (M_pad, N_pad) != (M, N):
        out = out[:M, :N]
    return out


if __name__ == "__main__":
    key = jax.random.PRNGKey(0)

    # --- Small shapes consistent with the module (a batch of aggregated heat
    # gains ∑q -> zone-temperature deltas). -----------------------------------
    batch, input_size, output_size = 8, 32, 16
    kx, kw, kx2, kw2 = jax.random.split(key, 4)

    x = jax.random.normal(kx, (batch, input_size), dtype=jnp.float32)
    bound = 1.0 / (input_size ** 0.5)
    weight = jax.random.uniform(
        kw, (output_size, input_size), minval=-bound, maxval=bound,
        dtype=jnp.float32,
    )

    out = zone_forward(x, weight)
    jax.block_until_ready(out)
    ref = x @ weight.T
    assert out.shape == (batch, output_size)
    assert jnp.allclose(out, ref, atol=1e-5, rtol=1e-5)

    # --- Larger case that exercises the tiled / accumulating path
    # (grid > 1 along every axis plus N padding + slice). ---------------------
    M2, K2, N2 = 256, 512, 384
    x2 = jax.random.normal(kx2, (M2, K2), dtype=jnp.float32)
    w2 = jax.random.normal(kw2, (N2, K2), dtype=jnp.float32) * (1.0 / K2 ** 0.5)

    out2 = zone_forward(x2, w2)
    jax.block_until_ready(out2)
    ref2 = x2 @ w2.T
    assert out2.shape == (M2, N2)
    assert jnp.allclose(out2, ref2, atol=1e-4, rtol=1e-4)

    print("KERNEL_OK")
</pallas_src>

<mosaic_0001>
module attributes {stable_mosaic.version = 11 : i64} {
  func.func @_zone_kernel(%arg0: i32, %arg1: i32, %arg2: i32, %arg3: memref<8x128xf32, #tpu.memory_space<vmem>>, %arg4: memref<128x128xf32, #tpu.memory_space<vmem>>, %arg5: memref<8x128xf32, #tpu.memory_space<vmem>>, %arg6: memref<8x128xf32, #tpu.memory_space<vmem>>) attributes {dimension_semantics = [#tpu.dimension_semantics<parallel>, #tpu.dimension_semantics<parallel>, #tpu.dimension_semantics<arbitrary>], iteration_bounds = array<i64: 1, 1, 1>, scalar_prefetch = 0 : i64, scratch_operands = 1 : i64, tpu.core_type = #tpu.core_type<tc>, window_params = [{transform_indices = @transform_0, window_bounds = array<i64: 8, 128>}, {transform_indices = @transform_1, window_bounds = array<i64: 128, 128>}, {transform_indices = @transform_2, window_bounds = array<i64: 8, 128>}]} {
    %c0_i32 = arith.constant 0 : i32
    %0 = arith.cmpi eq, %arg2, %c0_i32 : i32
    %1 = arith.extui %0 : i1 to i32
    %c0_i32_0 = arith.constant 0 : i32
    %2 = arith.cmpi ne, %1, %c0_i32_0 : i32
    scf.if %2 {
      %cst_10 = arith.constant 0.000000e+00 : f32
      %12 = vector.broadcast %cst_10 : f32 to vector<8x128xf32>
      %c0_11 = arith.constant 0 : index
      %c0_12 = arith.constant 0 : index
      %13 = vector.load %arg6[%c0_11, %c0_12] : memref<8x128xf32, #tpu.memory_space<vmem>>, vector<8x128xf32>
      tpu.vector_store %arg6[%c0_11, %c0_12], %12 {strides = array<i32>} : memref<8x128xf32, #tpu.memory_space<vmem>>, vector<8x128xf32>,
    } else {
    }
    %c0 = arith.constant 0 : index
    %c0_1 = arith.constant 0 : index
    %3 = vector.load %arg6[%c0, %c0_1] : memref<8x128xf32, #tpu.memory_space<vmem>>, vector<8x128xf32>
    %c0_2 = arith.constant 0 : index
    %c0_3 = arith.constant 0 : index
    %4 = vector.load %arg3[%c0_2, %c0_3] : memref<8x128xf32, #tpu.memory_space<vmem>>, vector<8x128xf32>
    %c0_4 = arith.constant 0 : index
    %c0_5 = arith.constant 0 : index
    %5 = vector.load %arg4[%c0_4, %c0_5] : memref<128x128xf32, #tpu.memory_space<vmem>>, vector<128x128xf32>
    %cst = arith.constant dense<0.000000e+00> : vector<8x128xf32>
    %6 = tpu.matmul %4, %5, %cst {dimension_numbers = #tpu.dot_dimension_numbers<[1], [1], [0], [0], [0, 0, 1, 0], [], []>} : vector<8x128xf32>, vector<128x128xf32>, vector<8x128xf32> -> vector<8x128xf32>
    %7 = arith.addf %3, %6 : vector<8x128xf32>
    %c0_6 = arith.constant 0 : index
    %c0_7 = arith.constant 0 : index
    %8 = vector.load %arg6[%c0_6, %c0_7] : memref<8x128xf32, #tpu.memory_space<vmem>>, vector<8x128xf32>
    tpu.vector_store %arg6[%c0_6, %c0_7], %7 {strides = array<i32>} : memref<8x128xf32, #tpu.memory_space<vmem>>, vector<8x128xf32>,
    %c0_i32_8 = arith.constant 0 : i32
    %9 = arith.cmpi eq, %arg2, %c0_i32_8 : i32
    %10 = arith.extui %9 : i1 to i32
    %c0_i32_9 = arith.constant 0 : i32
    %11 = arith.cmpi ne, %10, %c0_i32_9 : i32
    scf.if %11 {
      %c0_10 = arith.constant 0 : index
      %c0_11 = arith.constant 0 : index
      %12 = vector.load %arg6[%c0_10, %c0_11] : memref<8x128xf32, #tpu.memory_space<vmem>>, vector<8x128xf32>
      %c0_12 = arith.constant 0 : index
      %c0_13 = arith.constant 0 : index
      %13 = vector.load %arg5[%c0_12, %c0_13] : memref<8x128xf32, #tpu.memory_space<vmem>>, vector<8x128xf32>
      tpu.vector_store %arg5[%c0_12, %c0_13], %12 {strides = array<i32>} : memref<8x128xf32, #tpu.memory_space<vmem>>, vector<8x128xf32>,
    } else {
    }
    return
  }
  func.func @transform_0(%arg0: i32, %arg1: i32, %arg2: i32) -> (i32, i32) {
    %c0_i32 = arith.constant 0 : i32
    return %arg0, %arg2 : i32, i32
  }
  func.func @transform_1(%arg0: i32, %arg1: i32, %arg2: i32) -> (i32, i32) {
    %c0_i32 = arith.constant 0 : i32
    return %arg1, %arg2 : i32, i32
  }
  func.func @transform_2(%arg0: i32, %arg1: i32, %arg2: i32) -> (i32, i32) {
    %c0_i32 = arith.constant 0 : i32
    return %arg0, %arg1 : i32, i32
  }
}

</mosaic_0001>

<bundles_post_ra>
// kernel: tpu_custom_call.1
= control target key start
LH: loop header
LB: loop body
LE: loop exit
PB: predicated region body
PF: predicated region fallthrough
CT: control target
= control target key end

     0   :  { %7 = vsyncpa [#allocation4], 0  ;;  %s222_s0 = inlined_call_operand.hbm [shape: f32[8,128], index: 0, kind: input, shape index: {}]   ;;  %s223_s1 = inlined_call_operand.hbm [shape: f32[128,128], index: 1, kind: input, shape index: {}]   ;;  %s224_s2 = inlined_call_operand.hbm [shape: f32[8,128], index: 2, kind: output, shape index: {}]  }
   0x1   :  { %8 = vsyncpa [#allocation7], 0 }
   0x2   :  { %9 = vsyncpa [#allocation5], 0  ;;  %s15_s11 = sshll.u32 %s222_s0, 4  ;;  %s193_s12 = smov [#allocation3]   ;;  %s16_s11 = int_to_ptr.hbm [resolvable:$true] %s15_s11 }
   0x3   :  { %s17_s13 = sshll.u32 %s193_s12, 4  ;;  %s25_s16 = sshll.u32 %s223_s1, 4  ;;  %s18_s13 = int_to_ptr.vmem [resolvable:$true] %s17_s13  ;;  %s26_s16 = int_to_ptr.hbm [resolvable:$true] %s25_s16 }
   0x4   :  { %20 = dma.hbm_to_vmem [thread:$0]  %s16_s11, 128, %s18_s13, [#allocation4]  }
   0x5   :  { %s194_s17 = smov [#allocation6]   ;;  %s195_s19 = smov 128  }
   0x6   :  { %s27_s18 = sshll.u32 %s194_s17, 4  ;;  %s196_s20 = smov 8   ;;  %s28_s18 = int_to_ptr.vmem [resolvable:$true] %s27_s18 }
   0x7   :  { %33 = dma.hbm_to_vmem [thread:$0]  %s26_s16, 2048, %s28_s18, [#allocation7], %s195_s19, %s195_s19, %s196_s20  }
   0x8   :  { %187 = dma.done.wait [#allocation4], 128  }
   0x9   :  { %188 = vsyncadd [#allocation4], 4294967168 }
   0xa   :  { %189 = dma.done.wait [#allocation7], 2048  }
   0xb   :  { %190 = vsyncadd [#allocation7], 4294965248  ;;  %v64_v0 = vld [vmem:[#allocation6 + $0x78] sm:$0xff]  ;;  %v63_v1 = vld [vmem:[#allocation6 + $0x70] sm:$0xff]  ;;  %s197_s0 = smov [#allocation8]   ;;  %s99_s23 = sshll.u32 %s224_s2, 4  ;;  %s100_s23 = int_to_ptr.hbm [resolvable:$true] %s99_s23 }
   0xc   :  { %65 = vmatpush.xpose.msra.mxu0 %v64_v0  ;;  %v62_v2 = vld [vmem:[#allocation6 + $0x68] sm:$0xff]  ;;  %v61_v3 = vld [vmem:[#allocation6 + $0x60] sm:$0xff]  ;;  %v60_v4 = vld [vmem:[#allocation6 + $0x58] sm:$0xff]  ;;  %s97_s1 = sshll.u32 %s197_s0, 4  ;;  %s98_s1 = int_to_ptr.vmem [resolvable:$true] %s97_s1 }
   0xd   :  { %v59_v5 = vld [vmem:[#allocation6 + $0x50] sm:$0xff]  ;;  %v58_v6 = vld [vmem:[#allocation6 + $0x48] sm:$0xff]  ;;  %v57_v7 = vld [vmem:[#allocation6 + $0x40] sm:$0xff] }
   0xe   :  { %v56_v8 = vld [vmem:[#allocation6 + $0x38] sm:$0xff]  ;;  %v55_v9 = vld [vmem:[#allocation6 + $0x30] sm:$0xff]  ;;  %v54_v10 = vld [vmem:[#allocation6 + $0x28] sm:$0xff] }
   0xf   :  { %v53_v11 = vld [vmem:[#allocation6 + $0x20] sm:$0xff]  ;;  %v52_v12 = vld [vmem:[#allocation6 + $0x18] sm:$0xff]  ;;  %v51_v13 = vld [vmem:[#allocation6 + $0x10] sm:$0xff] }
  0x10   :  { %66 = vmatpush.xpose.msra.mxu0 %v63_v1  ;;  %v50_v14 = vld [vmem:[#allocation6 + $0x8] sm:$0xff]  ;;  %v49_v15 = vld [vmem:[#allocation6] sm:$0xff]  ;;  %v48_v16 = vld [vmem:[#allocation3] sm:$0xff] }
  0x14   :  { %67 = vmatpush.xpose.msra.mxu0 %v62_v2 }
  0x18   :  { %68 = vmatpush.xpose.msra.mxu0 %v61_v3 }
  0x1c   :  { %69 = vmatpush.xpose.msra.mxu0 %v60_v4 }
  0x20   :  { %70 = vmatpush.xpose.msra.mxu0 %v59_v5 }
  0x24   :  { %71 = vmatpush.xpose.msra.mxu0 %v58_v6 }
  0x28   :  { %72 = vmatpush.xpose.msra.mxu0 %v57_v7 }
  0x2c   :  { %73 = vmatpush.xpose.msra.mxu0 %v56_v8 }
  0x30   :  { %74 = vmatpush.xpose.msra.mxu0 %v55_v9 }
  0x34   :  { %75 = vmatpush.xpose.msra.mxu0 %v54_v10 }
  0x38   :  { %76 = vmatpush.xpose.msra.mxu0 %v53_v11 }
  0x3c   :  { %77 = vmatpush.xpose.msra.mxu0 %v52_v12 }
  0x40   :  { %78 = vmatpush.xpose.msra.mxu0 %v51_v13 }
  0x44   :  { %79 = vmatpush.xpose.msra.mxu0 %v50_v14 }
  0x48   :  { %80 = vmatpush.xpose.msra.mxu0 %v49_v15 }
  0x4b   :  { %81 = vmatmul.f32.vlgmr.msra.gmra.mxu0 %v48_v16 }
  0xc8   :  { %v82_v17 = vpop.f32.mrf.mxu0 }
  0xc9   :  { %91 = vst [vmem:[#allocation8] sm:$0xff] %v82_v17 }
  0xca   :  { %102 = dma.vmem_to_hbm [thread:$0]  %s98_s1, 128, %s100_s23, [#allocation5]  }
  0xcb   :  { %191 = dma.done.wait [#allocation5], 128  }
  0xcc   :  { %192 = vsyncadd [#allocation5], 4294967168 }
  0xcd   :  { %107 = vsyncpa [#allocation4], 1 }
  0xce   :  { %108 = vsyncpa [#allocation7], 1 }
  0xcf   :  { %109 = vsyncpa [#allocation5], 1 }

</bundles_post_ra>
